<compile_context>
chip_gen: v6e
topology: v6e:2x2x1
jax: 0.10.0
libtpu: 0.0.40
codegen_flags: <defaults>
</compile_context>

<pallas_src>
import functools

import jax
import jax.numpy as jnp
from jax import lax
from jax.experimental import pallas as pl
from jax.experimental.pallas import tpu as pltpu


def _round_up(v: int, m: int) -> int:
    return (v + m - 1) // m * m


def _linear_kernel(x_ref, w_ref, b_ref, o_ref, acc_ref):
    # x_ref:   (tm, tk)  bf16 activations
    # w_ref:   (tn, tk)  bf16 weight tile in native (N, K) layout
    # b_ref:   (1,  tn)  f32 bias row
    # o_ref:   (tm, tn)  output tile
    # acc_ref: (tm, tn)  f32 accumulator, resident across the K grid axis
    k = pl.program_id(2)

    @pl.when(k == 0)
    def _():
        acc_ref[...] = jnp.zeros_like(acc_ref)

    # Contract on K without transposing the weight: (tm,tk) . (tn,tk)^T -> (tm,tn)
    acc_ref[...] += lax.dot_general(
        x_ref[...],
        w_ref[...],
        dimension_numbers=(((1,), (1,)), ((), ())),
        preferred_element_type=jnp.float32,
    )

    @pl.when(k == pl.num_programs(2) - 1)
    def _():
        # Bias add only in the finalize branch, in f32, then cast on store.
        o_ref[...] = (acc_ref[...] + b_ref[...]).astype(o_ref.dtype)


@functools.partial(jax.jit, static_argnames=("tm", "tn", "tk"))
def linear_forward(
    x: jax.Array,
    weight: jax.Array,
    bias: jax.Array,
    *,
    tm: int = 256,
    tn: int = 256,
    tk: int = 512,
) -> jax.Array:
    """Pallas TPU implementation of nn.Linear forward: y = x @ weight.T + bias.

    x:      (M, K)  activations
    weight: (N, K)  torch.nn.Linear.weight layout (out_features, in_features)
    bias:   (N,)
    """
    M, K = x.shape
    N, K2 = weight.shape
    assert K == K2, "in_features mismatch"
    out_dtype = x.dtype

    # Clamp tile sizes to the (128-aligned) padded problem dims so small
    # problems still produce valid lane-dense blocks.
    tm = min(tm, _round_up(M, 128))
    tn = min(tn, _round_up(N, 128))
    tk = min(tk, _round_up(K, 128))

    Mp, Np, Kp = _round_up(M, tm), _round_up(N, tn), _round_up(K, tk)

    # Zero-pad to tile multiples (zeros do not change the dot product).
    xp = x if (Mp, Kp) == (M, K) else jnp.pad(x, ((0, Mp - M), (0, Kp - K)))
    wp = weight if (Np, Kp) == (N, K) else jnp.pad(weight, ((0, Np - N), (0, Kp - K)))
    bp = bias if Np == N else jnp.pad(bias, (0, Np - N))

    # Feed the MXU in bf16; keep the accumulator / bias / epilogue in f32.
    xp = xp.astype(jnp.bfloat16)
    wp = wp.astype(jnp.bfloat16)
    bp = bp.reshape(1, Np).astype(jnp.float32)

    grid = (Mp // tm, Np // tn, Kp // tk)

    # Conservative VMEM budget: double-buffered bf16 inputs + double-buffered
    # output + resident f32 accumulator + bias, with 2x margin, capped well
    # under v7x's 64 MiB physical VMEM.
    out_itemsize = jnp.dtype(out_dtype).itemsize
    vmem_bytes = (
        2 * (tm * tk + tn * tk) * 2      # x / w double buffers (bf16)
        + 2 * tm * tn * out_itemsize     # output double buffer
        + tm * tn * 4                    # f32 accumulator scratch
        + 2 * tn * 4                     # bias double buffer
    )
    vmem_limit = min(2 * vmem_bytes + (4 << 20), 48 << 20)

    cost = pl.CostEstimate(
        flops=2 * Mp * Np * Kp,
        transcendentals=0,
        bytes_accessed=(Mp * Kp * 2 + Np * Kp * 2 + Np * 4 + Mp * Np * out_itemsize),
    )

    yp = pl.pallas_call(
        _linear_kernel,
        out_shape=jax.ShapeDtypeStruct((Mp, Np), out_dtype),
        grid_spec=pltpu.PrefetchScalarGridSpec(
            num_scalar_prefetch=0,
            grid=grid,
            in_specs=[
                pl.BlockSpec((tm, tk), lambda i, j, k: (i, k)),   # activations
                pl.BlockSpec((tn, tk), lambda i, j, k: (j, k)),   # weight, native (N, K)
                pl.BlockSpec((1, tn), lambda i, j, k: (0, j)),    # bias row
            ],
            out_specs=pl.BlockSpec((tm, tn), lambda i, j, k: (i, j)),
            scratch_shapes=[pltpu.VMEM((tm, tn), jnp.float32)],
        ),
        compiler_params=pltpu.CompilerParams(
            dimension_semantics=("parallel", "parallel", "arbitrary"),
            vmem_limit_bytes=vmem_limit,
        ),
        cost_estimate=cost,
    )(xp, wp, bp)

    # Slice padding back off.
    if (Mp, Np) != (M, N):
        yp = yp[:M, :N]
    return yp


if __name__ == "__main__":
    # Deterministic synthetic parameters for a LinearWrapper wrapping
    # nn.Linear(in_features=32, out_features=32), batch=8.
    batch, in_features, out_features = 8, 32, 32

    key = jax.random.PRNGKey(0)
    kx, kw, kb = jax.random.split(key, 3)
    x = jax.random.normal(kx, (batch, in_features), dtype=jnp.float32)
    weight = jax.random.normal(kw, (out_features, in_features), dtype=jnp.float32) * 0.1
    bias = jax.random.normal(kb, (out_features,), dtype=jnp.float32) * 0.1

    y = linear_forward(x, weight, bias)
    y = jax.block_until_ready(y)

    # Reference check (plain JAX, f32) — same math as torch.nn.Linear forward.
    # bf16 MXU inputs => looser tolerance than pure-f32.
    y_ref = x @ weight.T + bias
    assert y.shape == y_ref.shape
    assert jnp.allclose(y, y_ref, atol=3e-2, rtol=3e-2), "mismatch vs reference"

    # TODO(synk): lower_bound/upper_bound (split_layer neg/pos bound propagation)
    # are not part of forward() and are not implemented here.

    print("KERNEL_OK")
</pallas_src>

<mosaic_0001>
module attributes {stable_mosaic.version = 11 : i64} {
  func.func @_linear_kernel(%arg0: i32, %arg1: i32, %arg2: i32, %arg3: memref<128x128xbf16, #tpu.memory_space<vmem>>, %arg4: memref<128x128xbf16, #tpu.memory_space<vmem>>, %arg5: memref<1x128xf32, #tpu.memory_space<vmem>>, %arg6: memref<128x128xf32, #tpu.memory_space<vmem>>, %arg7: memref<128x128xf32, #tpu.memory_space<vmem>>) attributes {dimension_semantics = [#tpu.dimension_semantics<parallel>, #tpu.dimension_semantics<parallel>, #tpu.dimension_semantics<arbitrary>], iteration_bounds = array<i64: 1, 1, 1>, scalar_prefetch = 0 : i64, scratch_operands = 1 : i64, tpu.core_type = #tpu.core_type<tc>, window_params = [{transform_indices = @transform_0, window_bounds = array<i64: 128, 128>}, {transform_indices = @transform_1, window_bounds = array<i64: 128, 128>}, {transform_indices = @transform_2, window_bounds = array<i64: 1, 128>}, {transform_indices = @transform_3, window_bounds = array<i64: 128, 128>}]} {
    %c0_i32 = arith.constant 0 : i32
    %0 = arith.cmpi eq, %arg2, %c0_i32 : i32
    %1 = arith.extui %0 : i1 to i32
    %c0_i32_0 = arith.constant 0 : i32
    %2 = arith.cmpi ne, %1, %c0_i32_0 : i32
    scf.if %2 {
      %cst_10 = arith.constant 0.000000e+00 : f32
      %12 = vector.broadcast %cst_10 : f32 to vector<128x128xf32>
      %c0_11 = arith.constant 0 : index
      %c0_12 = arith.constant 0 : index
      %13 = vector.load %arg7[%c0_11, %c0_12] : memref<128x128xf32, #tpu.memory_space<vmem>>, vector<128x128xf32>
      tpu.vector_store %arg7[%c0_11, %c0_12], %12 {strides = array<i32>} : memref<128x128xf32, #tpu.memory_space<vmem>>, vector<128x128xf32>,
    } else {
    }
    %c0 = arith.constant 0 : index
    %c0_1 = arith.constant 0 : index
    %3 = vector.load %arg7[%c0, %c0_1] : memref<128x128xf32, #tpu.memory_space<vmem>>, vector<128x128xf32>
    %c0_2 = arith.constant 0 : index
    %c0_3 = arith.constant 0 : index
    %4 = vector.load %arg3[%c0_2, %c0_3] : memref<128x128xbf16, #tpu.memory_space<vmem>>, vector<128x128xbf16>
    %c0_4 = arith.constant 0 : index
    %c0_5 = arith.constant 0 : index
    %5 = vector.load %arg4[%c0_4, %c0_5] : memref<128x128xbf16, #tpu.memory_space<vmem>>, vector<128x128xbf16>
    %cst = arith.constant dense<0.000000e+00> : vector<128x128xf32>
    %6 = tpu.matmul %4, %5, %cst {dimension_numbers = #tpu.dot_dimension_numbers<[1], [1], [0], [0], [0, 0, 1, 0], [], []>} : vector<128x128xbf16>, vector<128x128xbf16>, vector<128x128xf32> -> vector<128x128xf32>
    %7 = arith.addf %3, %6 : vector<128x128xf32>
    %c0_6 = arith.constant 0 : index
    %c0_7 = arith.constant 0 : index
    %8 = vector.load %arg7[%c0_6, %c0_7] : memref<128x128xf32, #tpu.memory_space<vmem>>, vector<128x128xf32>
    tpu.vector_store %arg7[%c0_6, %c0_7], %7 {strides = array<i32>} : memref<128x128xf32, #tpu.memory_space<vmem>>, vector<128x128xf32>,
    %c0_i32_8 = arith.constant 0 : i32
    %9 = arith.cmpi eq, %arg2, %c0_i32_8 : i32
    %10 = arith.extui %9 : i1 to i32
    %c0_i32_9 = arith.constant 0 : i32
    %11 = arith.cmpi ne, %10, %c0_i32_9 : i32
    scf.if %11 {
      %c0_10 = arith.constant 0 : index
      %c0_11 = arith.constant 0 : index
      %12 = vector.load %arg7[%c0_10, %c0_11] : memref<128x128xf32, #tpu.memory_space<vmem>>, vector<128x128xf32>
      %c0_12 = arith.constant 0 : index
      %c0_13 = arith.constant 0 : index
      %13 = vector.load %arg5[%c0_12, %c0_13] : memref<1x128xf32, #tpu.memory_space<vmem>>, vector<1x128xf32>
      %14 = vector.broadcast %13 : vector<1x128xf32> to vector<128x128xf32>
      %15 = arith.addf %12, %14 : vector<128x128xf32>
      %c0_14 = arith.constant 0 : index
      %c0_15 = arith.constant 0 : index
      %16 = vector.load %arg6[%c0_14, %c0_15] : memref<128x128xf32, #tpu.memory_space<vmem>>, vector<128x128xf32>
      tpu.vector_store %arg6[%c0_14, %c0_15], %15 {strides = array<i32>} : memref<128x128xf32, #tpu.memory_space<vmem>>, vector<128x128xf32>,
    } else {
    }
    return
  }
  func.func @transform_0(%arg0: i32, %arg1: i32, %arg2: i32) -> (i32, i32) {
    %c0_i32 = arith.constant 0 : i32
    return %arg0, %arg2 : i32, i32
  }
  func.func @transform_1(%arg0: i32, %arg1: i32, %arg2: i32) -> (i32, i32) {
    %c0_i32 = arith.constant 0 : i32
    return %arg1, %arg2 : i32, i32
  }
  func.func @transform_2(%arg0: i32, %arg1: i32, %arg2: i32) -> (i32, i32) {
    %c0_i32 = arith.constant 0 : i32
    %c0_i32_0 = arith.constant 0 : i32
    return %c0_i32, %arg1 : i32, i32
  }
  func.func @transform_3(%arg0: i32, %arg1: i32, %arg2: i32) -> (i32, i32) {
    %c0_i32 = arith.constant 0 : i32
    return %arg0, %arg1 : i32, i32
  }
}

</mosaic_0001>

<bundles_post_ra>
// kernel: linear_forward.1
= control target key start
LH: loop header
LB: loop body
LE: loop exit
PB: predicated region body
PF: predicated region fallthrough
CT: control target
= control target key end

     0   :  { %s586_s1 = inlined_call_operand.vmem [shape: bf16[128,128], index: 1, kind: input, shape index: {}]   ;;  %s587_s0 = inlined_call_operand.vmem [shape: bf16[128,128], index: 0, kind: input, shape index: {}]   ;;  %s588_s2 = inlined_call_operand.vmem [shape: f32[1,128], index: 2, kind: input, shape index: {}]   ;;  %s589_s3 = inlined_call_operand.vmem [shape: f32[128,128], index: 3, kind: output, shape index: {}]  }
   0x1   :  { %v451_v0 = vld [vmem:[%s586_s1 + $0x38] sm:$0xff]   ;;  %v452_v1 = vld [vmem:[%s586_s1 + $0x30] sm:$0xff]   ;;  %v453_v2 = vld [vmem:[%s586_s1 + $0x28] sm:$0xff]  }
   0x2   :  { %403 = vmatprep.subr.bf16.mxu0 %v451_v0  ;;  %435 = vmatprep.subr.bf16.mxu1 %v451_v0  ;;  %v459_v3 = vld [vmem:[%s587_s0] sm:$0xff]   ;;  %v455_v6 = vld [vmem:[%s586_s1 + $0x18] sm:$0xff]   ;;  %v456_v7 = vld [vmem:[%s586_s1 + $0x10] sm:$0xff]  }
   0x3   :  { %404 = vmatpush3.bf16.xpose.msra.mxu0 %v451_v0  ;;  %443 = vmatpush3.bf16.xpose.msra.mxu1 %v451_v0  ;;  %v460_v4 = vld [vmem:[%s587_s0 + $0x20] sm:$0xff]   ;;  %v457_v8 = vld [vmem:[%s586_s1 + $0x8] sm:$0xff]   ;;  %v463_v12 = vld [vmem:[%s587_s0 + $0x10] sm:$0xff]  }
   0x4   :  { %405 = vmatprep.subr.bf16.mxu0 %v452_v1  ;;  %436 = vmatprep.subr.bf16.mxu1 %v452_v1  ;;  %v454_v5 = vld [vmem:[%s586_s1 + $0x20] sm:$0xff]   ;;  %v461_v10 = vld [vmem:[%s587_s0 + $0x8] sm:$0xff]   ;;  %v464_v13 = vld [vmem:[%s587_s0 + $0x30] sm:$0xff]  }
   0x5   :  { %419 = vmatprep.mubr.bf16.mxu0 %v459_v3  ;;  %427 = vmatprep.mubr.bf16.mxu1 %v460_v4  ;;  %v458_v9 = vld [vmem:[%s586_s1] sm:$0xff]   ;;  %v462_v11 = vld [vmem:[%s587_s0 + $0x28] sm:$0xff]   ;;  %v465_v14 = vld [vmem:[%s587_s0 + $0x18] sm:$0xff]  }
   0x6   :  { %v466_v15 = vld [vmem:[%s587_s0 + $0x38] sm:$0xff]   ;;  %v386_v16 = vld [vmem:[%s588_s2] ss:$0 sm:$0xff] }
   0xb   :  { %406 = vmatpush3.bf16.xpose.msra.mxu0 %v452_v1  ;;  %444 = vmatpush3.bf16.xpose.msra.mxu1 %v452_v1 }
   0xc   :  { %407 = vmatprep.subr.bf16.mxu0 %v453_v2  ;;  %437 = vmatprep.subr.bf16.mxu1 %v453_v2 }
  0x13   :  { %408 = vmatpush3.bf16.xpose.msra.mxu0 %v453_v2  ;;  %445 = vmatpush3.bf16.xpose.msra.mxu1 %v453_v2 }
  0x14   :  { %409 = vmatprep.subr.bf16.mxu0 %v454_v5  ;;  %438 = vmatprep.subr.bf16.mxu1 %v454_v5 }
  0x1b   :  { %410 = vmatpush3.bf16.xpose.msra.mxu0 %v454_v5  ;;  %446 = vmatpush3.bf16.xpose.msra.mxu1 %v454_v5 }
  0x1c   :  { %411 = vmatprep.subr.bf16.mxu0 %v455_v6  ;;  %439 = vmatprep.subr.bf16.mxu1 %v455_v6 }
  0x23   :  { %412 = vmatpush3.bf16.xpose.msra.mxu0 %v455_v6  ;;  %447 = vmatpush3.bf16.xpose.msra.mxu1 %v455_v6 }
  0x24   :  { %413 = vmatprep.subr.bf16.mxu0 %v456_v7  ;;  %440 = vmatprep.subr.bf16.mxu1 %v456_v7 }
  0x2b   :  { %414 = vmatpush3.bf16.xpose.msra.mxu0 %v456_v7  ;;  %448 = vmatpush3.bf16.xpose.msra.mxu1 %v456_v7 }
  0x2c   :  { %415 = vmatprep.subr.bf16.mxu0 %v457_v8  ;;  %441 = vmatprep.subr.bf16.mxu1 %v457_v8 }
  0x33   :  { %416 = vmatpush3.bf16.xpose.msra.mxu0 %v457_v8  ;;  %449 = vmatpush3.bf16.xpose.msra.mxu1 %v457_v8 }
  0x34   :  { %417 = vmatprep.subr.bf16.mxu0 %v458_v9  ;;  %442 = vmatprep.subr.bf16.mxu1 %v458_v9 }
  0x3b   :  { %418 = vmatpush3.bf16.xpose.msra.mxu0 %v458_v9  ;;  %450 = vmatpush3.bf16.xpose.msra.mxu1 %v458_v9 }
  0x42   :  { %420 = vmatmul.mubr.bf16.vlgmr.msra.gmra.mxu0 %v461_v10  ;;  %428 = vmatmul.mubr.bf16.vlgmr.msra.gmra.mxu1 %v462_v11 }
  0x43   :  { %423 = vmatprep.mubr.bf16.mxu0 %v463_v12  ;;  %431 = vmatprep.mubr.bf16.mxu1 %v464_v13 }
  0x4a   :  { %424 = vmatmul.mubr.bf16.gmra.mxu0 %v465_v14  ;;  %432 = vmatmul.mubr.bf16.gmra.mxu1 %v466_v15 }
 0x102   :  { %v421_v17 = vpop.f32.mrf.mxu0  ;;  %v429_v18 = vpop.f32.mrf.mxu1 }
 0x103   :  { %v336_v19 = vadd.f32 %v421_v17, %v386_v16  ;;  %v344_v20 = vadd.f32 %v429_v18, %v386_v16 }
 0x104   :  { %v213_v21 = vpop.f32.mrf.mxu0  ;;  %v245_v22 = vpop.f32.mrf.mxu1 }
 0x105   :  { %352 = vst [vmem:[%s589_s3 + $0x10] sm:$0xff] %v336_v19  ;;  %360 = vst [vmem:[%s589_s3 + $0x50] sm:$0xff] %v344_v20  ;;  %v334_v23 = vadd.f32 %v386_v16, %v213_v21  ;;  %v342_v24 = vadd.f32 %v386_v16, %v245_v22 }
 0x106   :  { %v422_v25 = vpop.f32.mrf.mxu0  ;;  %v430_v26 = vpop.f32.mrf.mxu1 }
 0x107   :  { %350 = vst [vmem:[%s589_s3] sm:$0xff] %v334_v23  ;;  %358 = vst [vmem:[%s589_s3 + $0x40] sm:$0xff] %v342_v24  ;;  %v337_v27 = vadd.f32 %v422_v25, %v386_v16  ;;  %v345_v28 = vadd.f32 %v430_v26, %v386_v16 }
 0x108   :  { %v216_v29 = vpop.f32.mrf.mxu0  ;;  %v248_v30 = vpop.f32.mrf.mxu1 }
 0x109   :  { %353 = vst [vmem:[%s589_s3 + $0x18] sm:$0xff] %v337_v27  ;;  %361 = vst [vmem:[%s589_s3 + $0x58] sm:$0xff] %v345_v28  ;;  %v335_v31 = vadd.f32 %v386_v16, %v216_v29  ;;  %v343_v32 = vadd.f32 %v386_v16, %v248_v30 }
 0x10a   :  { %v425_v33 = vpop.f32.mrf.mxu0  ;;  %v433_v34 = vpop.f32.mrf.mxu1 }
 0x10b   :  { %351 = vst [vmem:[%s589_s3 + $0x8] sm:$0xff] %v335_v31  ;;  %359 = vst [vmem:[%s589_s3 + $0x48] sm:$0xff] %v343_v32  ;;  %v340_v35 = vadd.f32 %v425_v33, %v386_v16  ;;  %v348_v36 = vadd.f32 %v433_v34, %v386_v16 }
 0x10c   :  { %v229_v37 = vpop.f32.mrf.mxu0  ;;  %v261_v38 = vpop.f32.mrf.mxu1 }
 0x10d   :  { %356 = vst [vmem:[%s589_s3 + $0x30] sm:$0xff] %v340_v35  ;;  %364 = vst [vmem:[%s589_s3 + $0x70] sm:$0xff] %v348_v36  ;;  %v338_v39 = vadd.f32 %v386_v16, %v229_v37  ;;  %v346_v40 = vadd.f32 %v386_v16, %v261_v38 }
 0x10e   :  { %v426_v41 = vpop.f32.mrf.mxu0  ;;  %v434_v42 = vpop.f32.mrf.mxu1 }
 0x10f   :  { %354 = vst [vmem:[%s589_s3 + $0x20] sm:$0xff] %v338_v39  ;;  %362 = vst [vmem:[%s589_s3 + $0x60] sm:$0xff] %v346_v40  ;;  %v341_v43 = vadd.f32 %v426_v41, %v386_v16  ;;  %v349_v44 = vadd.f32 %v434_v42, %v386_v16 }
 0x110   :  { %v232_v45 = vpop.f32.mrf.mxu0  ;;  %v264_v46 = vpop.f32.mrf.mxu1 }
 0x111   :  { %357 = vst [vmem:[%s589_s3 + $0x38] sm:$0xff] %v341_v43  ;;  %365 = vst [vmem:[%s589_s3 + $0x78] sm:$0xff] %v349_v44  ;;  %v339_v47 = vadd.f32 %v386_v16, %v232_v45  ;;  %v347_v48 = vadd.f32 %v386_v16, %v264_v46 }
 0x113   :  { %355 = vst [vmem:[%s589_s3 + $0x28] sm:$0xff] %v339_v47  ;;  %363 = vst [vmem:[%s589_s3 + $0x68] sm:$0xff] %v347_v48 }

</bundles_post_ra>
